<compile_context>
chip_gen: v6e
topology: v6e:2x2x1
jax: 0.10.0
libtpu: 0.0.40
codegen_flags: <defaults>
</compile_context>

<pallas_src>
import functools

import jax
import jax.numpy as jnp
from jax.experimental import pallas as pl
from jax.experimental.pallas import tpu as pltpu

EPS = 1e-5              # PyTorch BatchNorm1d default eps
LANES = 128             # TPU lane width; all feature axes padded to this
DEFAULT_TILE_N = 2048   # rows per tile for the multi-tile (large-batch) path
FUSED_MAX_ROWS = 4096   # batches up to this many padded rows use the fused path


def _round_up(x, m):
    return (x + m - 1) // m * m


def _mosaic_params(semantics=("parallel",)):
    return pltpu.CompilerParams(dimension_semantics=semantics)


# ---------------------------------------------------------------------------
# Fused single-tile kernel: whole 6-layer MLP in one pallas_call
# ---------------------------------------------------------------------------
def _fused_mlp_kernel(x_ref, w_ref, b_ref, g_ref, be_ref, o_ref, *,
                      n_valid, inv_n):
    """w_ref: (6,128,128)  b_ref: (6,1,128)  g_ref/be_ref: (5,1,128)."""
    n_rows = x_ref.shape[0]
    valid = jax.lax.broadcasted_iota(jnp.int32, (n_rows, 1), 0) < n_valid
    h = x_ref[...]
    for i in range(5):
        h = jnp.maximum(
            jnp.dot(h, w_ref[i], preferred_element_type=jnp.float32) + b_ref[i],
            0.0)
        hm = jnp.where(valid, h, 0.0)     # exclude batch-padding rows from stats
        mean = jnp.sum(hm, axis=0, keepdims=True) * inv_n
        var = jnp.maximum(
            jnp.sum(hm * hm, axis=0, keepdims=True) * inv_n - mean * mean, 0.0)
        scale = g_ref[i] * jax.lax.rsqrt(var + EPS)   # gamma==0 on padded lanes
        shift = be_ref[i] - scale * mean
        h = h * scale + shift
    o_ref[...] = (jnp.dot(h, w_ref[5], preferred_element_type=jnp.float32)
                  + b_ref[5])


def _fused_forward(x_pad, params, *, n_valid):
    n_pad = x_pad.shape[0]
    kernel = functools.partial(_fused_mlp_kernel, n_valid=n_valid,
                               inv_n=1.0 / float(n_valid))
    return pl.pallas_call(
        kernel,
        grid=(1,),
        in_specs=[
            pl.BlockSpec((n_pad, LANES), lambda i: (0, 0)),
            pl.BlockSpec((6, LANES, LANES), lambda i: (0, 0, 0)),
            pl.BlockSpec((6, 1, LANES), lambda i: (0, 0, 0)),
            pl.BlockSpec((5, 1, LANES), lambda i: (0, 0, 0)),
            pl.BlockSpec((5, 1, LANES), lambda i: (0, 0, 0)),
        ],
        out_specs=pl.BlockSpec((n_pad, LANES), lambda i: (0, 0)),
        out_shape=jax.ShapeDtypeStruct((n_pad, LANES), jnp.float32),
        compiler_params=_mosaic_params(("arbitrary",)),
    )(x_pad, params["w"], params["b"], params["g"], params["be"])


# ---------------------------------------------------------------------------
# Multi-tile (large-batch) kernels: one pallas_call per layer
# ---------------------------------------------------------------------------
def _write_tile_stats(stats_ref, h, tile_n, n_valid):
    row = (pl.program_id(0) * tile_n
           + jax.lax.broadcasted_iota(jnp.int32, (tile_n, 1), 0))
    hm = jnp.where(row < n_valid, h, 0.0)
    stats_ref[0] = jnp.concatenate(
        [jnp.sum(hm, axis=0, keepdims=True),
         jnp.sum(hm * hm, axis=0, keepdims=True)], axis=0)   # (2, 128)


def _bn_scale_shift(s_ref, g_ref, be_ref, inv_n):
    mean = s_ref[0:1, :] * inv_n
    var = jnp.maximum(s_ref[1:2, :] * inv_n - mean * mean, 0.0)
    scale = g_ref[...] * jax.lax.rsqrt(var + EPS)
    shift = be_ref[...] - scale * mean
    return scale, shift


def _first_layer_kernel(x_ref, w_ref, b_ref, h_ref, stats_ref, *,
                        tile_n, n_valid):
    h = jnp.maximum(
        jnp.dot(x_ref[...], w_ref[...], preferred_element_type=jnp.float32)
        + b_ref[...], 0.0)
    h_ref[...] = h
    _write_tile_stats(stats_ref, h, tile_n, n_valid)


def _mid_layer_kernel(x_ref, s_ref, g_ref, be_ref, w_ref, b_ref,
                      h_ref, stats_ref, *, tile_n, n_valid, inv_n):
    scale, shift = _bn_scale_shift(s_ref, g_ref, be_ref, inv_n)
    xb = x_ref[...] * scale + shift
    h = jnp.maximum(
        jnp.dot(xb, w_ref[...], preferred_element_type=jnp.float32)
        + b_ref[...], 0.0)
    h_ref[...] = h
    _write_tile_stats(stats_ref, h, tile_n, n_valid)


def _final_layer_kernel(x_ref, s_ref, g_ref, be_ref, w_ref, b_ref, o_ref, *,
                        inv_n):
    scale, shift = _bn_scale_shift(s_ref, g_ref, be_ref, inv_n)
    xb = x_ref[...] * scale + shift
    o_ref[...] = (jnp.dot(xb, w_ref[...], preferred_element_type=jnp.float32)
                  + b_ref[...])


def _first_layer(x_pad, w, b, *, tile_n, n_valid):
    n_pad = x_pad.shape[0]
    n_tiles = n_pad // tile_n
    kernel = functools.partial(_first_layer_kernel, tile_n=tile_n,
                               n_valid=n_valid)
    return pl.pallas_call(
        kernel,
        grid=(n_tiles,),
        in_specs=[
            pl.BlockSpec((tile_n, LANES), lambda i: (i, 0)),
            pl.BlockSpec((LANES, LANES), lambda i: (0, 0)),
            pl.BlockSpec((1, LANES), lambda i: (0, 0)),
        ],
        out_specs=[
            pl.BlockSpec((tile_n, LANES), lambda i: (i, 0)),
            pl.BlockSpec((1, 2, LANES), lambda i: (i, 0, 0)),
        ],
        out_shape=[
            jax.ShapeDtypeStruct((n_pad, LANES), jnp.float32),
            jax.ShapeDtypeStruct((n_tiles, 2, LANES), jnp.float32),
        ],
        compiler_params=_mosaic_params(),
    )(x_pad, w, b)


def _mid_layer(x_pad, s, g, be, w, b, *, tile_n, n_valid, inv_n):
    n_pad = x_pad.shape[0]
    n_tiles = n_pad // tile_n
    kernel = functools.partial(_mid_layer_kernel, tile_n=tile_n,
                               n_valid=n_valid, inv_n=inv_n)
    return pl.pallas_call(
        kernel,
        grid=(n_tiles,),
        in_specs=[
            pl.BlockSpec((tile_n, LANES), lambda i: (i, 0)),
            pl.BlockSpec((2, LANES), lambda i: (0, 0)),
            pl.BlockSpec((1, LANES), lambda i: (0, 0)),
            pl.BlockSpec((1, LANES), lambda i: (0, 0)),
            pl.BlockSpec((LANES, LANES), lambda i: (0, 0)),
            pl.BlockSpec((1, LANES), lambda i: (0, 0)),
        ],
        out_specs=[
            pl.BlockSpec((tile_n, LANES), lambda i: (i, 0)),
            pl.BlockSpec((1, 2, LANES), lambda i: (i, 0, 0)),
        ],
        out_shape=[
            jax.ShapeDtypeStruct((n_pad, LANES), jnp.float32),
            jax.ShapeDtypeStruct((n_tiles, 2, LANES), jnp.float32),
        ],
        compiler_params=_mosaic_params(),
    )(x_pad, s, g, be, w, b)


def _final_layer(x_pad, s, g, be, w, b, *, tile_n, inv_n):
    n_pad = x_pad.shape[0]
    n_tiles = n_pad // tile_n
    kernel = functools.partial(_final_layer_kernel, inv_n=inv_n)
    return pl.pallas_call(
        kernel,
        grid=(n_tiles,),
        in_specs=[
            pl.BlockSpec((tile_n, LANES), lambda i: (i, 0)),
            pl.BlockSpec((2, LANES), lambda i: (0, 0)),
            pl.BlockSpec((1, LANES), lambda i: (0, 0)),
            pl.BlockSpec((1, LANES), lambda i: (0, 0)),
            pl.BlockSpec((LANES, LANES), lambda i: (0, 0)),
            pl.BlockSpec((1, LANES), lambda i: (0, 0)),
        ],
        out_specs=pl.BlockSpec((tile_n, LANES), lambda i: (i, 0)),
        out_shape=jax.ShapeDtypeStruct((n_pad, LANES), jnp.float32),
        compiler_params=_mosaic_params(),
    )(x_pad, s, g, be, w, b)


# ---------------------------------------------------------------------------
# Parameters & forward pass
# ---------------------------------------------------------------------------
def init_params(key, in_dim, hidden_dim, out_dim):
    """PyTorch-style init (Linear ~ U(-1/sqrt(fan_in), 1/sqrt(fan_in)),
    BN gamma=1, beta=0), zero-padded to 128-lane-dense stacks.
    Weights stored as [layer, in, out]."""
    dims = [(in_dim, hidden_dim)] + [(hidden_dim, hidden_dim)] * 4 \
        + [(hidden_dim, out_dim)]
    ws, bs, gs, bes = [], [], [], []
    for i, (fi, fo) in enumerate(dims):
        key, kw, kb = jax.random.split(key, 3)
        bound = 1.0 / float(fi) ** 0.5
        w = jax.random.uniform(kw, (fi, fo), jnp.float32, -bound, bound)
        b = jax.random.uniform(kb, (fo,), jnp.float32, -bound, bound)
        ws.append(jnp.zeros((LANES, LANES), jnp.float32).at[:fi, :fo].set(w))
        bs.append(jnp.zeros((1, LANES), jnp.float32).at[0, :fo].set(b))
        if i < 5:  # BatchNorm after layers 0..4 (gamma/beta padded with zeros)
            gs.append(jnp.zeros((1, LANES), jnp.float32).at[0, :fo].set(1.0))
            bes.append(jnp.zeros((1, LANES), jnp.float32))
    return {"w": jnp.stack(ws), "b": jnp.stack(bs),
            "g": jnp.stack(gs), "be": jnp.stack(bes)}


def mlp_forward(x, pos, params, out_dim, *, tile_n=DEFAULT_TILE_N,
                fused_max_rows=FUSED_MAX_ROWS):
    n = x.shape[0]
    xin = jnp.concatenate([x, pos], axis=1).astype(jnp.float32)
    in_dim = xin.shape[1]
    n_pad8 = _round_up(n, 8)

    # ---- Fused path: whole batch fits one VMEM-resident tile ----
    if n_pad8 <= fused_max_rows:
        x_pad = jnp.zeros((n_pad8, LANES), jnp.float32).at[:n, :in_dim].set(xin)
        out = _fused_forward(x_pad, params, n_valid=n)
        return out[:n, :out_dim]

    # ---- Multi-tile path: per-layer calls, BN stats reduced across tiles ----
    tile_n = max(8, _round_up(min(tile_n, n_pad8), 8))
    n_pad = _round_up(n, tile_n)
    x_pad = jnp.zeros((n_pad, LANES), jnp.float32).at[:n, :in_dim].set(xin)
    inv_n = 1.0 / float(n)

    h, stats = _first_layer(x_pad, params["w"][0], params["b"][0],
                            tile_n=tile_n, n_valid=n)
    s = jnp.sum(stats, axis=0)                       # (2, 128): sum, sumsq
    for i in range(1, 5):
        h, stats = _mid_layer(h, s, params["g"][i - 1], params["be"][i - 1],
                              params["w"][i], params["b"][i],
                              tile_n=tile_n, n_valid=n, inv_n=inv_n)
        s = jnp.sum(stats, axis=0)
    out = _final_layer(h, s, params["g"][4], params["be"][4],
                       params["w"][5], params["b"][5],
                       tile_n=tile_n, inv_n=inv_n)
    return out[:n, :out_dim]


# ---------------------------------------------------------------------------
if __name__ == "__main__":
    # Small graph-style input: 16 nodes, 4 node features, 3-D positions.
    N, FEAT, POS, HIDDEN, OUT = 16, 4, 3, 32, 8
    in_dim = FEAT + POS

    key = jax.random.PRNGKey(0)
    kx, kp, kparams = jax.random.split(key, 3)
    x = jax.random.normal(kx, (N, FEAT), jnp.float32)
    pos = jax.random.normal(kp, (N, POS), jnp.float32)
    params = init_params(kparams, in_dim, HIDDEN, OUT)

    # Pure-JAX reference (unpadded, two-pass BN).
    def ref_forward(xx, pp, params):
        with jax.default_matmul_precision("highest"):
            h = jnp.concatenate([xx, pp], axis=1)
            dims = [in_dim] + [HIDDEN] * 5
            for i in range(5):
                h = jnp.dot(h, params["w"][i][:dims[i], :HIDDEN]) \
                    + params["b"][i][0, :HIDDEN]
                h = jnp.maximum(h, 0.0)
                m = h.mean(0)
                v = ((h - m) ** 2).mean(0)
                h = (h - m) * jax.lax.rsqrt(v + EPS) \
                    * params["g"][i][0, :HIDDEN] + params["be"][i][0, :HIDDEN]
            return jnp.dot(h, params["w"][5][:HIDDEN, :OUT]) \
                + params["b"][5][0, :OUT]

    # 1) Fused single-call path (the N=16 case).
    fwd = jax.jit(functools.partial(mlp_forward, out_dim=OUT))
    out = jax.block_until_ready(fwd(x, pos, params))
    assert out.shape == (N, OUT), out.shape
    ref = ref_forward(x, pos, params)
    assert bool(jnp.all(jnp.isfinite(out)))
    assert jnp.allclose(out, ref, atol=2e-3, rtol=2e-3), \
        float(jnp.max(jnp.abs(out - ref)))

    # 2) Exercise the multi-tile (large-batch) path too: force 3 row tiles.
    N2 = 300
    kx2, kp2 = jax.random.split(jax.random.PRNGKey(1))
    x2 = jax.random.normal(kx2, (N2, FEAT), jnp.float32)
    pos2 = jax.random.normal(kp2, (N2, POS), jnp.float32)
    fwd2 = jax.jit(functools.partial(mlp_forward, out_dim=OUT,
                                     tile_n=128, fused_max_rows=0))
    out2 = jax.block_until_ready(fwd2(x2, pos2, params))
    assert out2.shape == (N2, OUT), out2.shape
    ref2 = ref_forward(x2, pos2, params)
    assert bool(jnp.all(jnp.isfinite(out2)))
    assert jnp.allclose(out2, ref2, atol=2e-3, rtol=2e-3), \
        float(jnp.max(jnp.abs(out2 - ref2)))

    print("KERNEL_OK")
</pallas_src>

<mosaic_0001>
module attributes {stable_mosaic.version = 11 : i64} {
  func.func @_fused_mlp_kernel(%arg0: i32, %arg1: memref<16x128xf32, #tpu.memory_space<vmem>>, %arg2: memref<6x128x128xf32, #tpu.memory_space<vmem>>, %arg3: memref<6x1x128xf32, #tpu.memory_space<vmem>>, %arg4: memref<5x1x128xf32, #tpu.memory_space<vmem>>, %arg5: memref<5x1x128xf32, #tpu.memory_space<vmem>>, %arg6: memref<16x128xf32, #tpu.memory_space<vmem>>) attributes {dimension_semantics = [#tpu.dimension_semantics<arbitrary>], iteration_bounds = array<i64: 1>, scalar_prefetch = 0 : i64, scratch_operands = 0 : i64, tpu.core_type = #tpu.core_type<tc>, window_params = [{pipeline_mode = #tpu.pipeline_mode<synchronous>, transform_indices = @transform_0, window_bounds = array<i64: 16, 128>}, {pipeline_mode = #tpu.pipeline_mode<synchronous>, transform_indices = @transform_1, window_bounds = array<i64: 6, 128, 128>}, {pipeline_mode = #tpu.pipeline_mode<synchronous>, transform_indices = @transform_2, window_bounds = array<i64: 6, 1, 128>}, {pipeline_mode = #tpu.pipeline_mode<synchronous>, transform_indices = @transform_3, window_bounds = array<i64: 5, 1, 128>}, {pipeline_mode = #tpu.pipeline_mode<synchronous>, transform_indices = @transform_4, window_bounds = array<i64: 5, 1, 128>}, {pipeline_mode = #tpu.pipeline_mode<synchronous>, transform_indices = @transform_5, window_bounds = array<i64: 16, 128>}]} {
    %0 = tpu.iota {dimensions = array<i32: 0>} : vector<16x1xi32>
    %c16_i32 = arith.constant 16 : i32
    %1 = vector.broadcast %c16_i32 : i32 to vector<16x1xi32>
    %2 = arith.cmpi slt, %0, %1 : vector<16x1xi32>
    %c0 = arith.constant 0 : index
    %c0_0 = arith.constant 0 : index
    %3 = vector.load %arg1[%c0, %c0_0] : memref<16x128xf32, #tpu.memory_space<vmem>>, vector<16x128xf32>
    %c0_1 = arith.constant 0 : index
    %c0_2 = arith.constant 0 : index
    %c0_3 = arith.constant 0 : index
    %4 = vector.load %arg2[%c0_1, %c0_2, %c0_3] : memref<6x128x128xf32, #tpu.memory_space<vmem>>, vector<1x128x128xf32>
    %5 = vector.shape_cast %4 : vector<1x128x128xf32> to vector<128x128xf32>
    %cst = arith.constant dense<0.000000e+00> : vector<16x128xf32>
    %6 = tpu.matmul %3, %5, %cst {dimension_numbers = #tpu.dot_dimension_numbers<[1], [0], [0], [1], [0, 0, 1, 1], [], []>} : vector<16x128xf32>, vector<128x128xf32>, vector<16x128xf32> -> vector<16x128xf32>
    %c0_4 = arith.constant 0 : index
    %c0_5 = arith.constant 0 : index
    %c0_6 = arith.constant 0 : index
    %7 = vector.load %arg3[%c0_4, %c0_5, %c0_6] : memref<6x1x128xf32, #tpu.memory_space<vmem>>, vector<1x1x128xf32>
    %8 = vector.shape_cast %7 : vector<1x1x128xf32> to vector<1x128xf32>
    %9 = vector.broadcast %8 : vector<1x128xf32> to vector<16x128xf32>
    %10 = arith.addf %6, %9 : vector<16x128xf32>
    %cst_7 = arith.constant 0.000000e+00 : f32
    %11 = vector.broadcast %cst_7 : f32 to vector<16x128xf32>
    %12 = arith.maximumf %10, %11 : vector<16x128xf32>
    %cst_8 = arith.constant 0.000000e+00 : f32
    %13 = vector.shape_cast %2 : vector<16x1xi1> to vector<16x1xi1>
    %14 = vector.broadcast %13 : vector<16x1xi1> to vector<16x128xi1>
    %15 = vector.broadcast %cst_8 : f32 to vector<16x128xf32>
    %16 = arith.select %14, %12, %15 : vector<16x128xi1>, vector<16x128xf32>
    %cst_9 = arith.constant dense<0.000000e+00> : vector<128xf32>
    %17 = vector.multi_reduction <add>, %16, %cst_9 [0] : vector<16x128xf32> to vector<128xf32>
    %18 = vector.shape_cast %17 : vector<128xf32> to vector<1x128xf32>
    %cst_10 = arith.constant 6.250000e-02 : f32
    %19 = vector.broadcast %cst_10 : f32 to vector<1x128xf32>
    %20 = arith.mulf %18, %19 : vector<1x128xf32>
    %21 = arith.mulf %16, %16 : vector<16x128xf32>
    %cst_11 = arith.constant dense<0.000000e+00> : vector<128xf32>
    %22 = vector.multi_reduction <add>, %21, %cst_11 [0] : vector<16x128xf32> to vector<128xf32>
    %23 = vector.shape_cast %22 : vector<128xf32> to vector<1x128xf32>
    %cst_12 = arith.constant 6.250000e-02 : f32
    %24 = vector.broadcast %cst_12 : f32 to vector<1x128xf32>
    %25 = arith.mulf %23, %24 : vector<1x128xf32>
    %26 = arith.mulf %20, %20 : vector<1x128xf32>
    %27 = arith.subf %25, %26 : vector<1x128xf32>
    %cst_13 = arith.constant 0.000000e+00 : f32
    %28 = vector.broadcast %cst_13 : f32 to vector<1x128xf32>
    %29 = arith.maximumf %27, %28 : vector<1x128xf32>
    %c0_14 = arith.constant 0 : index
    %c0_15 = arith.constant 0 : index
    %c0_16 = arith.constant 0 : index
    %30 = vector.load %arg4[%c0_14, %c0_15, %c0_16] : memref<5x1x128xf32, #tpu.memory_space<vmem>>, vector<1x1x128xf32>
    %31 = vector.shape_cast %30 : vector<1x1x128xf32> to vector<1x128xf32>
    %cst_17 = arith.constant 9.99999974E-6 : f32
    %32 = vector.broadcast %cst_17 : f32 to vector<1x128xf32>
    %33 = arith.addf %29, %32 : vector<1x128xf32>
    %34 = math.rsqrt %33 : vector<1x128xf32>
    %35 = arith.mulf %31, %34 : vector<1x128xf32>
    %c0_18 = arith.constant 0 : index
    %c0_19 = arith.constant 0 : index
    %c0_20 = arith.constant 0 : index
    %36 = vector.load %arg5[%c0_18, %c0_19, %c0_20] : memref<5x1x128xf32, #tpu.memory_space<vmem>>, vector<1x1x128xf32>
    %37 = vector.shape_cast %36 : vector<1x1x128xf32> to vector<1x128xf32>
    %38 = arith.mulf %35, %20 : vector<1x128xf32>
    %39 = arith.subf %37, %38 : vector<1x128xf32>
    %40 = vector.broadcast %35 : vector<1x128xf32> to vector<16x128xf32>
    %41 = arith.mulf %12, %40 : vector<16x128xf32>
    %42 = vector.broadcast %39 : vector<1x128xf32> to vector<16x128xf32>
    %43 = arith.addf %41, %42 : vector<16x128xf32>
    %c1 = arith.constant 1 : index
    %c0_21 = arith.constant 0 : index
    %c0_22 = arith.constant 0 : index
    %44 = vector.load %arg2[%c1, %c0_21, %c0_22] : memref<6x128x128xf32, #tpu.memory_space<vmem>>, vector<1x128x128xf32>
    %45 = vector.shape_cast %44 : vector<1x128x128xf32> to vector<128x128xf32>
    %cst_23 = arith.constant dense<0.000000e+00> : vector<16x128xf32>
    %46 = tpu.matmul %43, %45, %cst_23 {dimension_numbers = #tpu.dot_dimension_numbers<[1], [0], [0], [1], [0, 0, 1, 1], [], []>} : vector<16x128xf32>, vector<128x128xf32>, vector<16x128xf32> -> vector<16x128xf32>
    %c1_24 = arith.constant 1 : index
    %c0_25 = arith.constant 0 : index
    %c0_26 = arith.constant 0 : index
    %47 = vector.load %arg3[%c1_24, %c0_25, %c0_26] : memref<6x1x128xf32, #tpu.memory_space<vmem>>, vector<1x1x128xf32>
    %48 = vector.shape_cast %47 : vector<1x1x128xf32> to vector<1x128xf32>
    %49 = vector.broadcast %48 : vector<1x128xf32> to vector<16x128xf32>
    %50 = arith.addf %46, %49 : vector<16x128xf32>
    %cst_27 = arith.constant 0.000000e+00 : f32
    %51 = vector.broadcast %cst_27 : f32 to vector<16x128xf32>
    %52 = arith.maximumf %50, %51 : vector<16x128xf32>
    %cst_28 = arith.constant 0.000000e+00 : f32
    %53 = vector.shape_cast %2 : vector<16x1xi1> to vector<16x1xi1>
    %54 = vector.broadcast %53 : vector<16x1xi1> to vector<16x128xi1>
    %55 = vector.broadcast %cst_28 : f32 to vector<16x128xf32>
    %56 = arith.select %54, %52, %55 : vector<16x128xi1>, vector<16x128xf32>
    %cst_29 = arith.constant dense<0.000000e+00> : vector<128xf32>
    %57 = vector.multi_reduction <add>, %56, %cst_29 [0] : vector<16x128xf32> to vector<128xf32>
    %58 = vector.shape_cast %57 : vector<128xf32> to vector<1x128xf32>
    %cst_30 = arith.constant 6.250000e-02 : f32
    %59 = vector.broadcast %cst_30 : f32 to vector<1x128xf32>
    %60 = arith.mulf %58, %59 : vector<1x128xf32>
    %61 = arith.mulf %56, %56 : vector<16x128xf32>
    %cst_31 = arith.constant dense<0.000000e+00> : vector<128xf32>
    %62 = vector.multi_reduction <add>, %61, %cst_31 [0] : vector<16x128xf32> to vector<128xf32>
    %63 = vector.shape_cast %62 : vector<128xf32> to vector<1x128xf32>
    %cst_32 = arith.constant 6.250000e-02 : f32
    %64 = vector.broadcast %cst_32 : f32 to vector<1x128xf32>
    %65 = arith.mulf %63, %64 : vector<1x128xf32>
    %66 = arith.mulf %60, %60 : vector<1x128xf32>
    %67 = arith.subf %65, %66 : vector<1x128xf32>
    %cst_33 = arith.constant 0.000000e+00 : f32
    %68 = vector.broadcast %cst_33 : f32 to vector<1x128xf32>
    %69 = arith.maximumf %67, %68 : vector<1x128xf32>
    %c1_34 = arith.constant 1 : index
    %c0_35 = arith.constant 0 : index
    %c0_36 = arith.constant 0 : index
    %70 = vector.load %arg4[%c1_34, %c0_35, %c0_36] : memref<5x1x128xf32, #tpu.memory_space<vmem>>, vector<1x1x128xf32>
    %71 = vector.shape_cast %70 : vector<1x1x128xf32> to vector<1x128xf32>
    %cst_37 = arith.constant 9.99999974E-6 : f32
    %72 = vector.broadcast %cst_37 : f32 to vector<1x128xf32>
    %73 = arith.addf %69, %72 : vector<1x128xf32>
    %74 = math.rsqrt %73 : vector<1x128xf32>
    %75 = arith.mulf %71, %74 : vector<1x128xf32>
    %c1_38 = arith.constant 1 : index
    %c0_39 = arith.constant 0 : index
    %c0_40 = arith.constant 0 : index
    %76 = vector.load %arg5[%c1_38, %c0_39, %c0_40] : memref<5x1x128xf32, #tpu.memory_space<vmem>>, vector<1x1x128xf32>
    %77 = vector.shape_cast %76 : vector<1x1x128xf32> to vector<1x128xf32>
    %78 = arith.mulf %75, %60 : vector<1x128xf32>
    %79 = arith.subf %77, %78 : vector<1x128xf32>
    %80 = vector.broadcast %75 : vector<1x128xf32> to vector<16x128xf32>
    %81 = arith.mulf %52, %80 : vector<16x128xf32>
    %82 = vector.broadcast %79 : vector<1x128xf32> to vector<16x128xf32>
    %83 = arith.addf %81, %82 : vector<16x128xf32>
    %c2 = arith.constant 2 : index
    %c0_41 = arith.constant 0 : index
    %c0_42 = arith.constant 0 : index
    %84 = vector.load %arg2[%c2, %c0_41, %c0_42] : memref<6x128x128xf32, #tpu.memory_space<vmem>>, vector<1x128x128xf32>
    %85 = vector.shape_cast %84 : vector<1x128x128xf32> to vector<128x128xf32>
    %cst_43 = arith.constant dense<0.000000e+00> : vector<16x128xf32>
    %86 = tpu.matmul %83, %85, %cst_43 {dimension_numbers = #tpu.dot_dimension_numbers<[1], [0], [0], [1], [0, 0, 1, 1], [], []>} : vector<16x128xf32>, vector<128x128xf32>, vector<16x128xf32> -> vector<16x128xf32>
    %c2_44 = arith.constant 2 : index
    %c0_45 = arith.constant 0 : index
    %c0_46 = arith.constant 0 : index
    %87 = vector.load %arg3[%c2_44, %c0_45, %c0_46] : memref<6x1x128xf32, #tpu.memory_space<vmem>>, vector<1x1x128xf32>
    %88 = vector.shape_cast %87 : vector<1x1x128xf32> to vector<1x128xf32>
    %89 = vector.broadcast %88 : vector<1x128xf32> to vector<16x128xf32>
    %90 = arith.addf %86, %89 : vector<16x128xf32>
    %cst_47 = arith.constant 0.000000e+00 : f32
    %91 = vector.broadcast %cst_47 : f32 to vector<16x128xf32>
    %92 = arith.maximumf %90, %91 : vector<16x128xf32>
    %cst_48 = arith.constant 0.000000e+00 : f32
    %93 = vector.shape_cast %2 : vector<16x1xi1> to vector<16x1xi1>
    %94 = vector.broadcast %93 : vector<16x1xi1> to vector<16x128xi1>
    %95 = vector.broadcast %cst_48 : f32 to vector<16x128xf32>
    %96 = arith.select %94, %92, %95 : vector<16x128xi1>, vector<16x128xf32>
    %cst_49 = arith.constant dense<0.000000e+00> : vector<128xf32>
    %97 = vector.multi_reduction <add>, %96, %cst_49 [0] : vector<16x128xf32> to vector<128xf32>
    %98 = vector.shape_cast %97 : vector<128xf32> to vector<1x128xf32>
    %cst_50 = arith.constant 6.250000e-02 : f32
    %99 = vector.broadcast %cst_50 : f32 to vector<1x128xf32>
    %100 = arith.mulf %98, %99 : vector<1x128xf32>
    %101 = arith.mulf %96, %96 : vector<16x128xf32>
    %cst_51 = arith.constant dense<0.000000e+00> : vector<128xf32>
    %102 = vector.multi_reduction <add>, %101, %cst_51 [0] : vector<16x128xf32> to vector<128xf32>
    %103 = vector.shape_cast %102 : vector<128xf32> to vector<1x128xf32>
    %cst_52 = arith.constant 6.250000e-02 : f32
    %104 = vector.broadcast %cst_52 : f32 to vector<1x128xf32>
    %105 = arith.mulf %103, %104 : vector<1x128xf32>
    %106 = arith.mulf %100, %100 : vector<1x128xf32>
    %107 = arith.subf %105, %106 : vector<1x128xf32>
    %cst_53 = arith.constant 0.000000e+00 : f32
    %108 = vector.broadcast %cst_53 : f32 to vector<1x128xf32>
    %109 = arith.maximumf %107, %108 : vector<1x128xf32>
    %c2_54 = arith.constant 2 : index
    %c0_55 = arith.constant 0 : index
    %c0_56 = arith.constant 0 : index
    %110 = vector.load %arg4[%c2_54, %c0_55, %c0_56] : memref<5x1x128xf32, #tpu.memory_space<vmem>>, vector<1x1x128xf32>
    %111 = vector.shape_cast %110 : vector<1x1x128xf32> to vector<1x128xf32>
    %cst_57 = arith.constant 9.99999974E-6 : f32
    %112 = vector.broadcast %cst_57 : f32 to vector<1x128xf32>
    %113 = arith.addf %109, %112 : vector<1x128xf32>
    %114 = math.rsqrt %113 : vector<1x128xf32>
    %115 = arith.mulf %111, %114 : vector<1x128xf32>
    %c2_58 = arith.constant 2 : index
    %c0_59 = arith.constant 0 : index
    %c0_60 = arith.constant 0 : index
    %116 = vector.load %arg5[%c2_58, %c0_59, %c0_60] : memref<5x1x128xf32, #tpu.memory_space<vmem>>, vector<1x1x128xf32>
    %117 = vector.shape_cast %116 : vector<1x1x128xf32> to vector<1x128xf32>
    %118 = arith.mulf %115, %100 : vector<1x128xf32>
    %119 = arith.subf %117, %118 : vector<1x128xf32>
    %120 = vector.broadcast %115 : vector<1x128xf32> to vector<16x128xf32>
    %121 = arith.mulf %92, %120 : vector<16x128xf32>
    %122 = vector.broadcast %119 : vector<1x128xf32> to vector<16x128xf32>
    %123 = arith.addf %121, %122 : vector<16x128xf32>
    %c3 = arith.constant 3 : index
    %c0_61 = arith.constant 0 : index
    %c0_62 = arith.constant 0 : index
    %124 = vector.load %arg2[%c3, %c0_61, %c0_62] : memref<6x128x128xf32, #tpu.memory_space<vmem>>, vector<1x128x128xf32>
    %125 = vector.shape_cast %124 : vector<1x128x128xf32> to vector<128x128xf32>
    %cst_63 = arith.constant dense<0.000000e+00> : vector<16x128xf32>
    %126 = tpu.matmul %123, %125, %cst_63 {dimension_numbers = #tpu.dot_dimension_numbers<[1], [0], [0], [1], [0, 0, 1, 1], [], []>} : vector<16x128xf32>, vector<128x128xf32>, vector<16x128xf32> -> vector<16x128xf32>
    %c3_64 = arith.constant 3 : index
    %c0_65 = arith.constant 0 : index
    %c0_66 = arith.constant 0 : index
    %127 = vector.load %arg3[%c3_64, %c0_65, %c0_66] : memref<6x1x128xf32, #tpu.memory_space<vmem>>, vector<1x1x128xf32>
    %128 = vector.shape_cast %127 : vector<1x1x128xf32> to vector<1x128xf32>
    %129 = vector.broadcast %128 : vector<1x128xf32> to vector<16x128xf32>
    %130 = arith.addf %126, %129 : vector<16x128xf32>
    %cst_67 = arith.constant 0.000000e+00 : f32
    %131 = vector.broadcast %cst_67 : f32 to vector<16x128xf32>
    %132 = arith.maximumf %130, %131 : vector<16x128xf32>
    %cst_68 = arith.constant 0.000000e+00 : f32
    %133 = vector.shape_cast %2 : vector<16x1xi1> to vector<16x1xi1>
    %134 = vector.broadcast %133 : vector<16x1xi1> to vector<16x128xi1>
    %135 = vector.broadcast %cst_68 : f32 to vector<16x128xf32>
    %136 = arith.select %134, %132, %135 : vector<16x128xi1>, vector<16x128xf32>
    %cst_69 = arith.constant dense<0.000000e+00> : vector<128xf32>
    %137 = vector.multi_reduction <add>, %136, %cst_69 [0] : vector<16x128xf32> to vector<128xf32>
    %138 = vector.shape_cast %137 : vector<128xf32> to vector<1x128xf32>
    %cst_70 = arith.constant 6.250000e-02 : f32
    %139 = vector.broadcast %cst_70 : f32 to vector<1x128xf32>
    %140 = arith.mulf %138, %139 : vector<1x128xf32>
    %141 = arith.mulf %136, %136 : vector<16x128xf32>
    %cst_71 = arith.constant dense<0.000000e+00> : vector<128xf32>
    %142 = vector.multi_reduction <add>, %141, %cst_71 [0] : vector<16x128xf32> to vector<128xf32>
    %143 = vector.shape_cast %142 : vector<128xf32> to vector<1x128xf32>
    %cst_72 = arith.constant 6.250000e-02 : f32
    %144 = vector.broadcast %cst_72 : f32 to vector<1x128xf32>
    %145 = arith.mulf %143, %144 : vector<1x128xf32>
    %146 = arith.mulf %140, %140 : vector<1x128xf32>
    %147 = arith.subf %145, %146 : vector<1x128xf32>
    %cst_73 = arith.constant 0.000000e+00 : f32
    %148 = vector.broadcast %cst_73 : f32 to vector<1x128xf32>
    %149 = arith.maximumf %147, %148 : vector<1x128xf32>
    %c3_74 = arith.constant 3 : index
    %c0_75 = arith.constant 0 : index
    %c0_76 = arith.constant 0 : index
    %150 = vector.load %arg4[%c3_74, %c0_75, %c0_76] : memref<5x1x128xf32, #tpu.memory_space<vmem>>, vector<1x1x128xf32>
    %151 = vector.shape_cast %150 : vector<1x1x128xf32> to vector<1x128xf32>
    %cst_77 = arith.constant 9.99999974E-6 : f32
    %152 = vector.broadcast %cst_77 : f32 to vector<1x128xf32>
    %153 = arith.addf %149, %152 : vector<1x128xf32>
    %154 = math.rsqrt %153 : vector<1x128xf32>
    %155 = arith.mulf %151, %154 : vector<1x128xf32>
    %c3_78 = arith.constant 3 : index
    %c0_79 = arith.constant 0 : index
    %c0_80 = arith.constant 0 : index
    %156 = vector.load %arg5[%c3_78, %c0_79, %c0_80] : memref<5x1x128xf32, #tpu.memory_space<vmem>>, vector<1x1x128xf32>
    %157 = vector.shape_cast %156 : vector<1x1x128xf32> to vector<1x128xf32>
    %158 = arith.mulf %155, %140 : vector<1x128xf32>
    %159 = arith.subf %157, %158 : vector<1x128xf32>
    %160 = vector.broadcast %155 : vector<1x128xf32> to vector<16x128xf32>
    %161 = arith.mulf %132, %160 : vector<16x128xf32>
    %162 = vector.broadcast %159 : vector<1x128xf32> to vector<16x128xf32>
    %163 = arith.addf %161, %162 : vector<16x128xf32>
    %c4 = arith.constant 4 : index
    %c0_81 = arith.constant 0 : index
    %c0_82 = arith.constant 0 : index
    %164 = vector.load %arg2[%c4, %c0_81, %c0_82] : memref<6x128x128xf32, #tpu.memory_space<vmem>>, vector<1x128x128xf32>
    %165 = vector.shape_cast %164 : vector<1x128x128xf32> to vector<128x128xf32>
    %cst_83 = arith.constant dense<0.000000e+00> : vector<16x128xf32>
    %166 = tpu.matmul %163, %165, %cst_83 {dimension_numbers = #tpu.dot_dimension_numbers<[1], [0], [0], [1], [0, 0, 1, 1], [], []>} : vector<16x128xf32>, vector<128x128xf32>, vector<16x128xf32> -> vector<16x128xf32>
    %c4_84 = arith.constant 4 : index
    %c0_85 = arith.constant 0 : index
    %c0_86 = arith.constant 0 : index
    %167 = vector.load %arg3[%c4_84, %c0_85, %c0_86] : memref<6x1x128xf32, #tpu.memory_space<vmem>>, vector<1x1x128xf32>
    %168 = vector.shape_cast %167 : vector<1x1x128xf32> to vector<1x128xf32>
    %169 = vector.broadcast %168 : vector<1x128xf32> to vector<16x128xf32>
    %170 = arith.addf %166, %169 : vector<16x128xf32>
    %cst_87 = arith.constant 0.000000e+00 : f32
    %171 = vector.broadcast %cst_87 : f32 to vector<16x128xf32>
    %172 = arith.maximumf %170, %171 : vector<16x128xf32>
    %cst_88 = arith.constant 0.000000e+00 : f32
    %173 = vector.shape_cast %2 : vector<16x1xi1> to vector<16x1xi1>
    %174 = vector.broadcast %173 : vector<16x1xi1> to vector<16x128xi1>
    %175 = vector.broadcast %cst_88 : f32 to vector<16x128xf32>
    %176 = arith.select %174, %172, %175 : vector<16x128xi1>, vector<16x128xf32>
    %cst_89 = arith.constant dense<0.000000e+00> : vector<128xf32>
    %177 = vector.multi_reduction <add>, %176, %cst_89 [0] : vector<16x128xf32> to vector<128xf32>
    %178 = vector.shape_cast %177 : vector<128xf32> to vector<1x128xf32>
    %cst_90 = arith.constant 6.250000e-02 : f32
    %179 = vector.broadcast %cst_90 : f32 to vector<1x128xf32>
    %180 = arith.mulf %178, %179 : vector<1x128xf32>
    %181 = arith.mulf %176, %176 : vector<16x128xf32>
    %cst_91 = arith.constant dense<0.000000e+00> : vector<128xf32>
    %182 = vector.multi_reduction <add>, %181, %cst_91 [0] : vector<16x128xf32> to vector<128xf32>
    %183 = vector.shape_cast %182 : vector<128xf32> to vector<1x128xf32>
    %cst_92 = arith.constant 6.250000e-02 : f32
    %184 = vector.broadcast %cst_92 : f32 to vector<1x128xf32>
    %185 = arith.mulf %183, %184 : vector<1x128xf32>
    %186 = arith.mulf %180, %180 : vector<1x128xf32>
    %187 = arith.subf %185, %186 : vector<1x128xf32>
    %cst_93 = arith.constant 0.000000e+00 : f32
    %188 = vector.broadcast %cst_93 : f32 to vector<1x128xf32>
    %189 = arith.maximumf %187, %188 : vector<1x128xf32>
    %c4_94 = arith.constant 4 : index
    %c0_95 = arith.constant 0 : index
    %c0_96 = arith.constant 0 : index
    %190 = vector.load %arg4[%c4_94, %c0_95, %c0_96] : memref<5x1x128xf32, #tpu.memory_space<vmem>>, vector<1x1x128xf32>
    %191 = vector.shape_cast %190 : vector<1x1x128xf32> to vector<1x128xf32>
    %cst_97 = arith.constant 9.99999974E-6 : f32
    %192 = vector.broadcast %cst_97 : f32 to vector<1x128xf32>
    %193 = arith.addf %189, %192 : vector<1x128xf32>
    %194 = math.rsqrt %193 : vector<1x128xf32>
    %195 = arith.mulf %191, %194 : vector<1x128xf32>
    %c4_98 = arith.constant 4 : index
    %c0_99 = arith.constant 0 : index
    %c0_100 = arith.constant 0 : index
    %196 = vector.load %arg5[%c4_98, %c0_99, %c0_100] : memref<5x1x128xf32, #tpu.memory_space<vmem>>, vector<1x1x128xf32>
    %197 = vector.shape_cast %196 : vector<1x1x128xf32> to vector<1x128xf32>
    %198 = arith.mulf %195, %180 : vector<1x128xf32>
    %199 = arith.subf %197, %198 : vector<1x128xf32>
    %200 = vector.broadcast %195 : vector<1x128xf32> to vector<16x128xf32>
    %201 = arith.mulf %172, %200 : vector<16x128xf32>
    %202 = vector.broadcast %199 : vector<1x128xf32> to vector<16x128xf32>
    %203 = arith.addf %201, %202 : vector<16x128xf32>
    %c5 = arith.constant 5 : index
    %c0_101 = arith.constant 0 : index
    %c0_102 = arith.constant 0 : index
    %204 = vector.load %arg2[%c5, %c0_101, %c0_102] : memref<6x128x128xf32, #tpu.memory_space<vmem>>, vector<1x128x128xf32>
    %205 = vector.shape_cast %204 : vector<1x128x128xf32> to vector<128x128xf32>
    %cst_103 = arith.constant dense<0.000000e+00> : vector<16x128xf32>
    %206 = tpu.matmul %203, %205, %cst_103 {dimension_numbers = #tpu.dot_dimension_numbers<[1], [0], [0], [1], [0, 0, 1, 1], [], []>} : vector<16x128xf32>, vector<128x128xf32>, vector<16x128xf32> -> vector<16x128xf32>
    %c5_104 = arith.constant 5 : index
    %c0_105 = arith.constant 0 : index
    %c0_106 = arith.constant 0 : index
    %207 = vector.load %arg3[%c5_104, %c0_105, %c0_106] : memref<6x1x128xf32, #tpu.memory_space<vmem>>, vector<1x1x128xf32>
    %208 = vector.shape_cast %207 : vector<1x1x128xf32> to vector<1x128xf32>
    %209 = vector.broadcast %208 : vector<1x128xf32> to vector<16x128xf32>
    %210 = arith.addf %206, %209 : vector<16x128xf32>
    %c0_107 = arith.constant 0 : index
    %c0_108 = arith.constant 0 : index
    %211 = vector.load %arg6[%c0_107, %c0_108] : memref<16x128xf32, #tpu.memory_space<vmem>>, vector<16x128xf32>
    tpu.vector_store %arg6[%c0_107, %c0_108], %210 {strides = array<i32>} : memref<16x128xf32, #tpu.memory_space<vmem>>, vector<16x128xf32>,
    return
  }
  func.func @transform_0(%arg0: i32) -> (i32, i32) {
    %c0_i32 = arith.constant 0 : i32
    %c0_i32_0 = arith.constant 0 : i32
    %c0_i32_1 = arith.constant 0 : i32
    return %c0_i32, %c0_i32_0 : i32, i32
  }
  func.func @transform_1(%arg0: i32) -> (i32, i32, i32) {
    %c0_i32 = arith.constant 0 : i32
    %c0_i32_0 = arith.constant 0 : i32
    %c0_i32_1 = arith.constant 0 : i32
    %c0_i32_2 = arith.constant 0 : i32
    return %c0_i32, %c0_i32_0, %c0_i32_1 : i32, i32, i32
  }
  func.func @transform_2(%arg0: i32) -> (i32, i32, i32) {
    %c0_i32 = arith.constant 0 : i32
    %c0_i32_0 = arith.constant 0 : i32
    %c0_i32_1 = arith.constant 0 : i32
    %c0_i32_2 = arith.constant 0 : i32
    return %c0_i32, %c0_i32_0, %c0_i32_1 : i32, i32, i32
  }
  func.func @transform_3(%arg0: i32) -> (i32, i32, i32) {
    %c0_i32 = arith.constant 0 : i32
    %c0_i32_0 = arith.constant 0 : i32
    %c0_i32_1 = arith.constant 0 : i32
    %c0_i32_2 = arith.constant 0 : i32
    return %c0_i32, %c0_i32_0, %c0_i32_1 : i32, i32, i32
  }
  func.func @transform_4(%arg0: i32) -> (i32, i32, i32) {
    %c0_i32 = arith.constant 0 : i32
    %c0_i32_0 = arith.constant 0 : i32
    %c0_i32_1 = arith.constant 0 : i32
    %c0_i32_2 = arith.constant 0 : i32
    return %c0_i32, %c0_i32_0, %c0_i32_1 : i32, i32, i32
  }
  func.func @transform_5(%arg0: i32) -> (i32, i32) {
    %c0_i32 = arith.constant 0 : i32
    %c0_i32_0 = arith.constant 0 : i32
    %c0_i32_1 = arith.constant 0 : i32
    return %c0_i32, %c0_i32_0 : i32, i32
  }
}

</mosaic_0001>

<bundles_post_ra>
// kernel: mlp_forward.1
= control target key start
LH: loop header
LB: loop body
LE: loop exit
PB: predicated region body
PF: predicated region fallthrough
CT: control target
= control target key end

     0   :  { %10 = vsyncpa [#allocation3], 0  ;;  %s1270_s18 = smov [#allocation2]   ;;  %s1378_s0 = inlined_call_operand.vmem [shape: f32[16,128], index: 0, kind: input, shape index: {}]   ;;  %s1379_s1 = inlined_call_operand.hbm [shape: f32[6,128,128], index: 1, kind: input, shape index: {}]   ;;  %s1380_s2 = inlined_call_operand.vmem [shape: f32[6,1,128], index: 2, kind: input, shape index: {}]   ;;  %s1381_s3 = inlined_call_operand.vmem [shape: f32[5,1,128], index: 3, kind: input, shape index: {}]   ;;  %s1382_s4 = inlined_call_operand.vmem [shape: f32[5,1,128], index: 4, kind: input, shape index: {}]   ;;  %s1383_s5 = inlined_call_operand.vmem [shape: f32[16,128], index: 5, kind: output, shape index: {}]  }
   0x1   :  { %s18_s19 = sshll.u32 %s1270_s18, 4  ;;  %s19_s19 = int_to_ptr.vmem [resolvable:$true] %s18_s19 }
   0x2   :  { %s1256_s20 = scalar_lea.vmem %s19_s19, 12288  ;;  %p1261_p1 = scmp.lt.s32.totalorder %s19_s19, %s19_s19 }
   0x3   :  { %p1257_p0 = scmp.ne.s32.totalorder %s19_s19, %s1256_s20  ;;  %p1262_p2 = scmp.lt.s32.totalorder %s1256_s20, %s1256_s20 }
   0x5   :  { %p1263_p3 = por %p1262_p2, %p1261_p1 }
   0x7   :  { %p1264_p4 = pnand %p1263_p3, %p1257_p0 }
   0x9   :  { %1267 = shalt.err (!%p1264_p4)
}
   0xa   :  { %s1271_s21 = smov 128   ;;  %s1272_s22 = smov 8  }
   0xb   :  { %24 = dma.hbm_to_vmem [thread:$0]  %s1379_s1, 12288, %s19_s19, [#allocation3], %s1271_s21, %s1271_s21, %s1272_s22  }
   0xc   :  { %1268 = dma.done.wait [#allocation3], 12288  }
   0xd   :  { %1269 = vsyncadd [#allocation3], 4294955008  ;;  %v56_v0 = vld [vmem:[#allocation2 + $0x78] sm:$0xff]  ;;  %v55_v1 = vld [vmem:[#allocation2 + $0x70] sm:$0xff]  ;;  %v176_v63 = vlaneseq }
   0xe   :  { %1025 = vmatprep.subr.mxu0 %v56_v0  ;;  %v54_v2 = vld [vmem:[#allocation2 + $0x68] sm:$0xff]  ;;  %v53_v3 = vld [vmem:[#allocation2 + $0x60] sm:$0xff]  ;;  %v52_v5 = vld [vmem:[#allocation2 + $0x58] sm:$0xff] }
   0xf   :  { %1026 = vmatpush3.msra.mxu0 %v56_v0  ;;  %v39_v4 = vld [vmem:[%s1378_s0] sm:$0xff]  ;;  %v51_v6 = vld [vmem:[#allocation2 + $0x50] sm:$0xff]  ;;  %v50_v7 = vld [vmem:[#allocation2 + $0x48] sm:$0xff]  ;;  %v177_v0 = vshrl.u32 %v176_v63, 7 }
  0x10   :  { %1027 = vmatprep.subr.mxu0 %v55_v1  ;;  %1057 = vmatprep.mubr.f32.mxu0 %v39_v4  ;;  %v49_v8 = vld [vmem:[#allocation2 + $0x40] sm:$0xff]  ;;  %v48_v9 = vld [vmem:[#allocation2 + $0x38] sm:$0xff]  ;;  %v47_v10 = vld [vmem:[#allocation2 + $0x30] sm:$0xff] }
  0x11   :  { %1028 = vmatpush3.msra.mxu0 %v55_v1  ;;  %v46_v11 = vld [vmem:[#allocation2 + $0x28] sm:$0xff]  ;;  %v45_v12 = vld [vmem:[#allocation2 + $0x20] sm:$0xff]  ;;  %v44_v13 = vld [vmem:[#allocation2 + $0x18] sm:$0xff] }
  0x12   :  { %1029 = vmatprep.subr.mxu0 %v54_v2  ;;  %v43_v14 = vld [vmem:[#allocation2 + $0x10] sm:$0xff]  ;;  %v42_v15 = vld [vmem:[#allocation2 + $0x8] sm:$0xff]  ;;  %v41_v16 = vld [vmem:[#allocation2] sm:$0xff] }
  0x13   :  { %1030 = vmatpush3.msra.mxu0 %v54_v2  ;;  %v40_v17 = vld [vmem:[%s1378_s0 + $0x8] sm:$0xff]  ;;  %v207_v18 = vld [vmem:[#allocation2 + $0xf8] sm:$0xff]  ;;  %v206_v19 = vld [vmem:[#allocation2 + $0xf0] sm:$0xff]  ;;  %v1318_v2 = vsub.s32 0, %v177_v0 }
  0x14   :  { %1031 = vmatprep.subr.mxu0 %v53_v3  ;;  %1060 = vmatprep.subr.mxu1 %v207_v18  ;;  %v205_v20 = vld [vmem:[#allocation2 + $0xe8] sm:$0xff]  ;;  %v204_v21 = vld [vmem:[#allocation2 + $0xe0] sm:$0xff]  ;;  %v203_v22 = vld [vmem:[#allocation2 + $0xd8] sm:$0xff] }
  0x15   :  { %1032 = vmatpush3.msra.mxu0 %v53_v3  ;;  %1061 = vmatpush3.msra.mxu1 %v207_v18  ;;  %v202_v23 = vld [vmem:[#allocation2 + $0xd0] sm:$0xff]  ;;  %v201_v24 = vld [vmem:[#allocation2 + $0xc8] sm:$0xff]  ;;  %v200_v25 = vld [vmem:[#allocation2 + $0xc0] sm:$0xff] }
  0x16   :  { %1033 = vmatprep.subr.mxu0 %v52_v5  ;;  %1062 = vmatprep.subr.mxu1 %v206_v19  ;;  %v199_v26 = vld [vmem:[#allocation2 + $0xb8] sm:$0xff]  ;;  %v198_v27 = vld [vmem:[#allocation2 + $0xb0] sm:$0xff]  ;;  %v197_v28 = vld [vmem:[#allocation2 + $0xa8] sm:$0xff] }
  0x17   :  { %1034 = vmatpush3.msra.mxu0 %v52_v5  ;;  %1063 = vmatpush3.msra.mxu1 %v206_v19  ;;  %v196_v29 = vld [vmem:[#allocation2 + $0xa0] sm:$0xff]  ;;  %v195_v30 = vld [vmem:[#allocation2 + $0x98] sm:$0xff]  ;;  %v194_v31 = vld [vmem:[#allocation2 + $0x90] sm:$0xff] }
  0x18   :  { %1035 = vmatprep.subr.mxu0 %v51_v6  ;;  %1064 = vmatprep.subr.mxu1 %v205_v20  ;;  %v193_v32 = vld [vmem:[#allocation2 + $0x88] sm:$0xff]  ;;  %v192_v33 = vld [vmem:[#allocation2 + $0x80] sm:$0xff]  ;;  %v353_v18 = vld [vmem:[#allocation2 + $0x158] sm:$0xff] }
  0x19   :  { %1036 = vmatpush3.msra.mxu0 %v51_v6  ;;  %1065 = vmatpush3.msra.mxu1 %v205_v20  ;;  %v898_v34 = vld [vmem:[%s1380_s2] ss:$0 sm:$0xff]  ;;  %v352_v19 = vld [vmem:[#allocation2 + $0x150] sm:$0xff]  ;;  %v351_v20 = vld [vmem:[#allocation2 + $0x148] sm:$0xff] }
  0x1a   :  { %1037 = vmatprep.subr.mxu0 %v50_v7  ;;  %1066 = vmatprep.subr.mxu1 %v204_v21  ;;  %v168_v1 = vld [vmem:[%s1381_s3] sm:$0x1] }
  0x1b   :  { %1038 = vmatpush3.msra.mxu0 %v50_v7  ;;  %1067 = vmatpush3.msra.mxu1 %v204_v21  ;;  %v172_v5 = vld [vmem:[%s1382_s4] sm:$0x1] }
  0x1c   :  { %1039 = vmatprep.subr.mxu0 %v49_v8  ;;  %1068 = vmatprep.subr.mxu1 %v203_v22  ;;  %v350_v21 = vld [vmem:[#allocation2 + $0x140] sm:$0xff] }
  0x1d   :  { %1040 = vmatpush3.msra.mxu0 %v49_v8  ;;  %1069 = vmatpush3.msra.mxu1 %v203_v22  ;;  %v349_v22 = vld [vmem:[#allocation2 + $0x138] sm:$0xff] }
  0x1e   :  { %1041 = vmatprep.subr.mxu0 %v48_v9  ;;  %1070 = vmatprep.subr.mxu1 %v202_v23 }
  0x1f   :  { %1042 = vmatpush3.msra.mxu0 %v48_v9  ;;  %1071 = vmatpush3.msra.mxu1 %v202_v23  ;;  %v348_v23 = vld [vmem:[#allocation2 + $0x130] sm:$0xff] }
  0x20   :  { %1043 = vmatprep.subr.mxu0 %v47_v10  ;;  %1072 = vmatprep.subr.mxu1 %v201_v24 }
  0x21   :  { %1044 = vmatpush3.msra.mxu0 %v47_v10  ;;  %1073 = vmatpush3.msra.mxu1 %v201_v24  ;;  %v347_v24 = vld [vmem:[#allocation2 + $0x128] sm:$0xff] }
  0x22   :  { %1045 = vmatprep.subr.mxu0 %v46_v11  ;;  %1074 = vmatprep.subr.mxu1 %v200_v25 }
  0x23   :  { %1046 = vmatpush3.msra.mxu0 %v46_v11  ;;  %1075 = vmatpush3.msra.mxu1 %v200_v25  ;;  %v346_v25 = vld [vmem:[#allocation2 + $0x120] sm:$0xff] }
  0x24   :  { %1047 = vmatprep.subr.mxu0 %v45_v12  ;;  %1076 = vmatprep.subr.mxu1 %v199_v26 }
  0x25   :  { %1048 = vmatpush3.msra.mxu0 %v45_v12  ;;  %1077 = vmatpush3.msra.mxu1 %v199_v26  ;;  %v345_v26 = vld [vmem:[#allocation2 + $0x118] sm:$0xff] }
  0x26   :  { %1049 = vmatprep.subr.mxu0 %v44_v13  ;;  %1078 = vmatprep.subr.mxu1 %v198_v27 }
  0x27   :  { %1050 = vmatpush3.msra.mxu0 %v44_v13  ;;  %1079 = vmatpush3.msra.mxu1 %v198_v27  ;;  %v344_v27 = vld [vmem:[#allocation2 + $0x110] sm:$0xff] }
  0x28   :  { %1051 = vmatprep.subr.mxu0 %v43_v14  ;;  %1080 = vmatprep.subr.mxu1 %v197_v28 }
  0x29   :  { %1052 = vmatpush3.msra.mxu0 %v43_v14  ;;  %1081 = vmatpush3.msra.mxu1 %v197_v28  ;;  %v357_v14 = vld [vmem:[#allocation2 + $0x178] sm:$0xff]  ;;  %v343_v28 = vld [vmem:[#allocation2 + $0x108] sm:$0xff] }
  0x2a   :  { %1053 = vmatprep.subr.mxu0 %v42_v15  ;;  %1082 = vmatprep.subr.mxu1 %v196_v29 }
  0x2b   :  { %1054 = vmatpush3.msra.mxu0 %v42_v15  ;;  %1083 = vmatpush3.msra.mxu1 %v196_v29  ;;  %v356_v15 = vld [vmem:[#allocation2 + $0x170] sm:$0xff]  ;;  %v342_v29 = vld [vmem:[#allocation2 + $0x100] sm:$0xff] }
  0x2c   :  { %1055 = vmatprep.subr.mxu0 %v41_v16  ;;  %1084 = vmatprep.subr.mxu1 %v195_v30 }
  0x2d   :  { %1056 = vmatpush3.msra.mxu0 %v41_v16  ;;  %1085 = vmatpush3.msra.mxu1 %v195_v30  ;;  %v355_v16 = vld [vmem:[#allocation2 + $0x168] sm:$0xff]  ;;  %v900_v30 = vld [vmem:[%s1380_s2 + $0x1] ss:$0 sm:$0xff] }
  0x2e   :  { %1058 = vmatmul.mubr.f32.vlgmr.msra.gmra.mxu0 %v40_v17  ;;  %1086 = vmatprep.subr.mxu1 %v194_v31  ;;  %v354_v17 = vld [vmem:[#allocation2 + $0x160] sm:$0xff] }
  0x2f   :  { %1087 = vmatpush3.msra.mxu1 %v194_v31  ;;  %1095 = vmatprep.subr.mxu0 %v357_v14 }
  0x30   :  { %1088 = vmatprep.subr.mxu1 %v193_v32  ;;  %1096 = vmatpush3.msra.mxu0 %v357_v14  ;;  %v501_v14 = vld [vmem:[#allocation2 + $0x1c8] sm:$0xff] }
  0x31   :  { %1089 = vmatpush3.msra.mxu1 %v193_v32  ;;  %1097 = vmatprep.subr.mxu0 %v356_v15 }
  0x32   :  { %1090 = vmatprep.subr.mxu1 %v192_v33  ;;  %1098 = vmatpush3.msra.mxu0 %v356_v15  ;;  %v500_v15 = vld [vmem:[#allocation2 + $0x1c0] sm:$0xff] }
  0x33   :  { %1091 = vmatpush3.msra.mxu1 %v192_v33  ;;  %1099 = vmatprep.subr.mxu0 %v355_v16 }
  0x34   :  { %1100 = vmatpush3.msra.mxu0 %v355_v16  ;;  %v499_v16 = vld [vmem:[#allocation2 + $0x1b8] sm:$0xff] }
  0x35   :  { %1101 = vmatprep.subr.mxu0 %v354_v17 }
  0x36   :  { %1102 = vmatpush3.msra.mxu0 %v354_v17  ;;  %v498_v17 = vld [vmem:[#allocation2 + $0x1b0] sm:$0xff] }
  0x37   :  { %1103 = vmatprep.subr.mxu0 %v353_v18 }
  0x38   :  { %1104 = vmatpush3.msra.mxu0 %v353_v18  ;;  %v497_v18 = vld [vmem:[#allocation2 + $0x1a8] sm:$0xff] }
  0x39   :  { %1105 = vmatprep.subr.mxu0 %v352_v19 }
  0x3a   :  { %1106 = vmatpush3.msra.mxu0 %v352_v19  ;;  %v496_v19 = vld [vmem:[#allocation2 + $0x1a0] sm:$0xff] }
  0x3b   :  { %1107 = vmatprep.subr.mxu0 %v351_v20 }
  0x3c   :  { %1108 = vmatpush3.msra.mxu0 %v351_v20  ;;  %v495_v20 = vld [vmem:[#allocation2 + $0x198] sm:$0xff] }
  0x3d   :  { %1109 = vmatprep.subr.mxu0 %v350_v21 }
  0x3e   :  { %1110 = vmatpush3.msra.mxu0 %v350_v21  ;;  %v494_v21 = vld [vmem:[#allocation2 + $0x190] sm:$0xff] }
  0x3f   :  { %1111 = vmatprep.subr.mxu0 %v349_v22 }
  0x40   :  { %1112 = vmatpush3.msra.mxu0 %v349_v22  ;;  %v493_v22 = vld [vmem:[#allocation2 + $0x188] sm:$0xff] }
  0x41   :  { %1113 = vmatprep.subr.mxu0 %v348_v23 }
  0x42   :  { %1114 = vmatpush3.msra.mxu0 %v348_v23  ;;  %v492_v23 = vld [vmem:[#allocation2 + $0x180] sm:$0xff] }
  0x43   :  { %1115 = vmatprep.subr.mxu0 %v347_v24 }
  0x44   :  { %1116 = vmatpush3.msra.mxu0 %v347_v24  ;;  %v904_v24 = vld [vmem:[%s1380_s2 + $0x2] ss:$0 sm:$0xff] }
  0x45   :  { %1117 = vmatprep.subr.mxu0 %v346_v25 }
  0x46   :  { %1118 = vmatpush3.msra.mxu0 %v346_v25 }
  0x47   :  { %1119 = vmatprep.subr.mxu0 %v345_v26 }
  0x48   :  { %1120 = vmatpush3.msra.mxu0 %v345_v26 }
  0x49   :  { %1121 = vmatprep.subr.mxu0 %v344_v27 }
  0x4a   :  { %1122 = vmatpush3.msra.mxu0 %v344_v27 }
  0x4b   :  { %1123 = vmatprep.subr.mxu0 %v343_v28 }
  0x4c   :  { %1124 = vmatpush3.msra.mxu0 %v343_v28 }
  0x4d   :  { %1125 = vmatprep.subr.mxu0 %v342_v29 }
  0x4e   :  { %1126 = vmatpush3.msra.mxu0 %v342_v29 }
  0xee   :  { %v1059_v35 = vpop.f32.mrf.mxu0 }
  0xef   :  { %v136_v36 = vadd.f32 %v1059_v35, %v898_v34 }
  0xf0   :  { %v130_v37 = vpop.f32.mrf.mxu0 }
  0xf1   :  { %v140_v38 = vmax.f32 %v136_v36, 0.0  ;;  %v131_v39 = vadd.f32 %v898_v34, %v130_v37 }
  0xf3   :  { %v139_v40 = vmax.f32 %v131_v39, 0.0  ;;  %v156_v41 = vmul.f32 %v140_v38, %v140_v38 }
  0xf5   :  { %v147_v42 = vadd.f32 %v140_v38, %v139_v40  ;;  %v155_v43 = vmul.f32 %v139_v40, %v139_v40 }
  0xf7   :  { %v148_v44 = vrot.slane %v147_v42, 4  ;;  %v157_v45 = vadd.f32 %v156_v41, %v155_v43 }
  0xf9   :  { %v149_v46 = vadd.f32 %v148_v44, %v147_v42  ;;  %v158_v47 = vrot.slane %v157_v45, 4 }
  0xfb   :  { %v150_v48 = vrot.slane %v149_v46, 2  ;;  %v159_v49 = vadd.f32 %v158_v47, %v157_v45 }
  0xfd   :  { %v151_v50 = vadd.f32 %v150_v48, %v149_v46  ;;  %v160_v51 = vrot.slane %v159_v49, 2 }
  0xff   :  { %v161_v52 = vadd.f32 %v160_v51, %v159_v49  ;;  %v152_v53 = vrot.slane %v151_v50, 1 }
 0x101   :  { %v162_v54 = vrot.slane %v161_v52, 1  ;;  %v153_v55 = vadd.f32 %v152_v53, %v151_v50 }
 0x103   :  { %v163_v56 = vadd.f32 %v162_v54, %v161_v52  ;;  %v154_v57 = vmul.f32 0.0625, %v153_v55 }
 0x105   :  { %v164_v58 = vmul.f32 0.0625, %v163_v56  ;;  %v165_v59 = vmul.f32 %v154_v57, %v154_v57 }
 0x107   :  { %v166_v60 = vsub.f32 %v164_v58, %v165_v59  ;;  %v901_v59 = vld [vmem:[%s1381_s3 + $0x1] sm:$0x1] }
 0x109   :  { %v167_v61 = vmax.f32 %v166_v60, 0.0 }
 0x10b   :  { %v169_v62 = vadd.f32 1e-05, %v167_v61 }
 0x10d   :  { %1238 = vrsqrt.f32 %v169_v62  ;;  %v902_v62 = vld [vmem:[%s1382_s4 + $0x1] sm:$0x1] }
 0x11a   :  { %v1239_v3 = vpop.eup %1238 }
 0x11b   :  { %v171_v4 = vmul.f32 %v1239_v3, %v168_v1 }
 0x11d   :  { %v173_v6 = vmul.f32 %v171_v4, %v154_v57  ;;  %v179_v7 = vrot.slane %v171_v4, %v1318_v2 }
 0x11f   :  { %v174_v8 = vsub.f32 %v172_v5, %v173_v6  ;;  %v181_v9 = vmul.f32 %v179_v7, %v139_v40  ;;  %v182_v11 = vmul.f32 %v179_v7, %v140_v38 }
 0x121   :  { %v187_v10 = vrot.slane %v174_v8, %v1318_v2  ;;  %v507_v8 = vld [vmem:[#allocation2 + $0x1f8] sm:$0xff] }
 0x122   :  { %1130 = vmatprep.subr.mxu1 %v507_v8 }
 0x123   :  { %v189_v12 = vadd.f32 %v187_v10, %v181_v9  ;;  %v190_v13 = vadd.f32 %v187_v10, %v182_v11  ;;  %v506_v9 = vld [vmem:[#allocation2 + $0x1f0] sm:$0xff]  ;;  %v505_v10 = vld [vmem:[#allocation2 + $0x1e8] sm:$0xff]  ;;  %v504_v11 = vld [vmem:[#allocation2 + $0x1e0] sm:$0xff] }
 0x125   :  { %1092 = vmatprep.mubr.f32.mxu1 %v189_v12  ;;  %v503_v12 = vld [vmem:[#allocation2 + $0x1d8] sm:$0xff] }
 0x126   :  { %1093 = vmatmul.mubr.f32.vlgmr.msra.gmra.mxu1 %v190_v13  ;;  %v502_v13 = vld [vmem:[#allocation2 + $0x1d0] sm:$0xff] }
 0x127   :  { %1131 = vmatpush3.msra.mxu1 %v507_v8  ;;  %v651_v8 = vld [vmem:[#allocation2 + $0x248] sm:$0xff] }
 0x128   :  { %1132 = vmatprep.subr.mxu1 %v506_v9 }
 0x129   :  { %1133 = vmatpush3.msra.mxu1 %v506_v9  ;;  %v650_v9 = vld [vmem:[#allocation2 + $0x240] sm:$0xff] }
 0x12a   :  { %1134 = vmatprep.subr.mxu1 %v505_v10 }
 0x12b   :  { %1135 = vmatpush3.msra.mxu1 %v505_v10  ;;  %v649_v10 = vld [vmem:[#allocation2 + $0x238] sm:$0xff] }
 0x12c   :  { %1136 = vmatprep.subr.mxu1 %v504_v11 }
 0x12d   :  { %1137 = vmatpush3.msra.mxu1 %v504_v11  ;;  %v648_v11 = vld [vmem:[#allocation2 + $0x230] sm:$0xff] }
 0x12e   :  { %1138 = vmatprep.subr.mxu1 %v503_v12 }
 0x12f   :  { %1139 = vmatpush3.msra.mxu1 %v503_v12  ;;  %v647_v12 = vld [vmem:[#allocation2 + $0x228] sm:$0xff] }
 0x130   :  { %1140 = vmatprep.subr.mxu1 %v502_v13 }
 0x131   :  { %1141 = vmatpush3.msra.mxu1 %v502_v13  ;;  %v646_v13 = vld [vmem:[#allocation2 + $0x220] sm:$0xff] }
 0x132   :  { %1142 = vmatprep.subr.mxu1 %v501_v14 }
 0x133   :  { %1143 = vmatpush3.msra.mxu1 %v501_v14  ;;  %v645_v14 = vld [vmem:[#allocation2 + $0x218] sm:$0xff] }
 0x134   :  { %1144 = vmatprep.subr.mxu1 %v500_v15 }
 0x135   :  { %1145 = vmatpush3.msra.mxu1 %v500_v15  ;;  %v644_v15 = vld [vmem:[#allocation2 + $0x210] sm:$0xff] }
 0x136   :  { %1146 = vmatprep.subr.mxu1 %v499_v16 }
 0x137   :  { %1147 = vmatpush3.msra.mxu1 %v499_v16  ;;  %v643_v16 = vld [vmem:[#allocation2 + $0x208] sm:$0xff] }
 0x138   :  { %1148 = vmatprep.subr.mxu1 %v498_v17 }
 0x139   :  { %1149 = vmatpush3.msra.mxu1 %v498_v17  ;;  %v642_v17 = vld [vmem:[#allocation2 + $0x200] sm:$0xff] }
 0x13a   :  { %1150 = vmatprep.subr.mxu1 %v497_v18 }
 0x13b   :  { %1151 = vmatpush3.msra.mxu1 %v497_v18  ;;  %v908_v18 = vld [vmem:[%s1380_s2 + $0x3] ss:$0 sm:$0xff] }
 0x13c   :  { %1152 = vmatprep.subr.mxu1 %v496_v19 }
 0x13d   :  { %1153 = vmatpush3.msra.mxu1 %v496_v19 }
 0x13e   :  { %1154 = vmatprep.subr.mxu1 %v495_v20 }
 0x13f   :  { %1155 = vmatpush3.msra.mxu1 %v495_v20 }
 0x140   :  { %1156 = vmatprep.subr.mxu1 %v494_v21 }
 0x141   :  { %1157 = vmatpush3.msra.mxu1 %v494_v21 }
 0x142   :  { %1158 = vmatprep.subr.mxu1 %v493_v22 }
 0x143   :  { %1159 = vmatpush3.msra.mxu1 %v493_v22 }
 0x144   :  { %1160 = vmatprep.subr.mxu1 %v492_v23 }
 0x145   :  { %1161 = vmatpush3.msra.mxu1 %v492_v23 }
 0x1e6   :  { %v1094_v31 = vpop.f32.mrf.mxu1 }
 0x1e7   :  { %v288_v32 = vadd.f32 %v1094_v31, %v900_v30 }
 0x1e8   :  { %v282_v33 = vpop.f32.mrf.mxu1 }
 0x1e9   :  { %v292_v34 = vmax.f32 %v288_v32, 0.0  ;;  %v283_v35 = vadd.f32 %v900_v30, %v282_v33 }
 0x1eb   :  { %v291_v36 = vmax.f32 %v283_v35, 0.0  ;;  %v304_v37 = vmul.f32 %v292_v34, %v292_v34 }
 0x1ed   :  { %v295_v38 = vadd.f32 %v292_v34, %v291_v36  ;;  %v303_v39 = vmul.f32 %v291_v36, %v291_v36 }
 0x1ef   :  { %v296_v40 = vrot.slane %v295_v38, 4  ;;  %v305_v41 = vadd.f32 %v304_v37, %v303_v39 }
 0x1f1   :  { %v297_v42 = vadd.f32 %v296_v40, %v295_v38  ;;  %v306_v43 = vrot.slane %v305_v41, 4 }
 0x1f3   :  { %v298_v44 = vrot.slane %v297_v42, 2  ;;  %v307_v45 = vadd.f32 %v306_v43, %v305_v41 }
 0x1f5   :  { %v299_v46 = vadd.f32 %v298_v44, %v297_v42  ;;  %v308_v47 = vrot.slane %v307_v45, 2 }
 0x1f7   :  { %v300_v48 = vrot.slane %v299_v46, 1  ;;  %v309_v49 = vadd.f32 %v308_v47, %v307_v45 }
 0x1f9   :  { %v301_v50 = vadd.f32 %v300_v48, %v299_v46  ;;  %v310_v51 = vrot.slane %v309_v49, 1 }
 0x1fb   :  { %v302_v52 = vmul.f32 0.0625, %v301_v50  ;;  %v311_v53 = vadd.f32 %v310_v51, %v309_v49 }
 0x1fd   :  { %v312_v54 = vmul.f32 0.0625, %v311_v53  ;;  %v313_v55 = vmul.f32 %v302_v52, %v302_v52  ;;  %v905_v53 = vld [vmem:[%s1381_s3 + $0x2] sm:$0x1] }
 0x1ff   :  { %v314_v56 = vsub.f32 %v312_v54, %v313_v55 }
 0x201   :  { %v315_v57 = vmax.f32 %v314_v56, 0.0  ;;  %v906_v56 = vld [vmem:[%s1382_s4 + $0x2] sm:$0x1] }
 0x203   :  { %v318_v58 = vadd.f32 1e-05, %v315_v57 }
 0x205   :  { %1240 = vrsqrt.f32 %v318_v58 }
 0x212   :  { %v1241_v60 = vpop.eup %1240 }
 0x213   :  { %v320_v61 = vmul.f32 %v1241_v60, %v901_v59 }
 0x215   :  { %v329_v63 = vrot.slane %v320_v61, %v1318_v2  ;;  %v323_v0 = vmul.f32 %v320_v61, %v302_v52 }
 0x217   :  { %v324_v1 = vsub.f32 %v902_v62, %v323_v0  ;;  %v331_v3 = vmul.f32 %v329_v63, %v291_v36  ;;  %v332_v5 = vmul.f32 %v329_v63, %v292_v34 }
 0x219   :  { %v337_v4 = vrot.slane %v324_v1, %v1318_v2  ;;  %v657_v1 = vld [vmem:[#allocation2 + $0x278] sm:$0xff] }
 0x21a   :  { %1165 = vmatprep.subr.mxu0 %v657_v1 }
 0x21b   :  { %v339_v6 = vadd.f32 %v337_v4, %v331_v3  ;;  %v340_v7 = vadd.f32 %v337_v4, %v332_v5  ;;  %v656_v3 = vld [vmem:[#allocation2 + $0x270] sm:$0xff]  ;;  %v655_v4 = vld [vmem:[#allocation2 + $0x268] sm:$0xff]  ;;  %v654_v5 = vld [vmem:[#allocation2 + $0x260] sm:$0xff] }
 0x21d   :  { %1127 = vmatprep.mubr.f32.mxu0 %v339_v6  ;;  %v653_v6 = vld [vmem:[#allocation2 + $0x258] sm:$0xff] }
 0x21e   :  { %1128 = vmatmul.mubr.f32.vlgmr.msra.gmra.mxu0 %v340_v7  ;;  %v652_v7 = vld [vmem:[#allocation2 + $0x250] sm:$0xff] }
 0x21f   :  { %1166 = vmatpush3.msra.mxu0 %v657_v1  ;;  %v801_v1 = vld [vmem:[#allocation2 + $0x2c8] sm:$0xff] }
 0x220   :  { %1167 = vmatprep.subr.mxu0 %v656_v3 }
 0x221   :  { %1168 = vmatpush3.msra.mxu0 %v656_v3  ;;  %v800_v3 = vld [vmem:[#allocation2 + $0x2c0] sm:$0xff] }
 0x222   :  { %1169 = vmatprep.subr.mxu0 %v655_v4 }
 0x223   :  { %1170 = vmatpush3.msra.mxu0 %v655_v4  ;;  %v799_v4 = vld [vmem:[#allocation2 + $0x2b8] sm:$0xff] }
 0x224   :  { %1171 = vmatprep.subr.mxu0 %v654_v5 }
 0x225   :  { %1172 = vmatpush3.msra.mxu0 %v654_v5  ;;  %v798_v5 = vld [vmem:[#allocation2 + $0x2b0] sm:$0xff] }
 0x226   :  { %1173 = vmatprep.subr.mxu0 %v653_v6 }
 0x227   :  { %1174 = vmatpush3.msra.mxu0 %v653_v6  ;;  %v797_v6 = vld [vmem:[#allocation2 + $0x2a8] sm:$0xff] }
 0x228   :  { %1175 = vmatprep.subr.mxu0 %v652_v7 }
 0x229   :  { %1176 = vmatpush3.msra.mxu0 %v652_v7  ;;  %v796_v7 = vld [vmem:[#allocation2 + $0x2a0] sm:$0xff] }
 0x22a   :  { %1177 = vmatprep.subr.mxu0 %v651_v8 }
 0x22b   :  { %1178 = vmatpush3.msra.mxu0 %v651_v8  ;;  %v795_v8 = vld [vmem:[#allocation2 + $0x298] sm:$0xff] }
 0x22c   :  { %1179 = vmatprep.subr.mxu0 %v650_v9 }
 0x22d   :  { %1180 = vmatpush3.msra.mxu0 %v650_v9  ;;  %v794_v9 = vld [vmem:[#allocation2 + $0x290] sm:$0xff] }
 0x22e   :  { %1181 = vmatprep.subr.mxu0 %v649_v10 }
 0x22f   :  { %1182 = vmatpush3.msra.mxu0 %v649_v10  ;;  %v793_v10 = vld [vmem:[#allocation2 + $0x288] sm:$0xff] }
 0x230   :  { %1183 = vmatprep.subr.mxu0 %v648_v11 }
 0x231   :  { %1184 = vmatpush3.msra.mxu0 %v648_v11  ;;  %v792_v11 = vld [vmem:[#allocation2 + $0x280] sm:$0xff] }
 0x232   :  { %1185 = vmatprep.subr.mxu0 %v647_v12 }
 0x233   :  { %1186 = vmatpush3.msra.mxu0 %v647_v12  ;;  %v912_v12 = vld [vmem:[%s1380_s2 + $0x4] ss:$0 sm:$0xff] }
 0x234   :  { %1187 = vmatprep.subr.mxu0 %v646_v13 }
 0x235   :  { %1188 = vmatpush3.msra.mxu0 %v646_v13 }
 0x236   :  { %1189 = vmatprep.subr.mxu0 %v645_v14 }
 0x237   :  { %1190 = vmatpush3.msra.mxu0 %v645_v14 }
 0x238   :  { %1191 = vmatprep.subr.mxu0 %v644_v15 }
 0x239   :  { %1192 = vmatpush3.msra.mxu0 %v644_v15 }
 0x23a   :  { %1193 = vmatprep.subr.mxu0 %v643_v16 }
 0x23b   :  { %1194 = vmatpush3.msra.mxu0 %v643_v16 }
 0x23c   :  { %1195 = vmatprep.subr.mxu0 %v642_v17 }
 0x23d   :  { %1196 = vmatpush3.msra.mxu0 %v642_v17 }
 0x2de   :  { %v1129_v25 = vpop.f32.mrf.mxu0 }
 0x2df   :  { %v438_v26 = vadd.f32 %v1129_v25, %v904_v24 }
 0x2e0   :  { %v432_v27 = vpop.f32.mrf.mxu0 }
 0x2e1   :  { %v442_v28 = vmax.f32 %v438_v26, 0.0  ;;  %v433_v29 = vadd.f32 %v904_v24, %v432_v27 }
 0x2e3   :  { %v441_v30 = vmax.f32 %v433_v29, 0.0  ;;  %v454_v31 = vmul.f32 %v442_v28, %v442_v28 }
 0x2e5   :  { %v445_v32 = vadd.f32 %v442_v28, %v441_v30  ;;  %v453_v33 = vmul.f32 %v441_v30, %v441_v30 }
 0x2e7   :  { %v446_v34 = vrot.slane %v445_v32, 4  ;;  %v455_v35 = vadd.f32 %v454_v31, %v453_v33 }
 0x2e9   :  { %v447_v36 = vadd.f32 %v446_v34, %v445_v32  ;;  %v456_v37 = vrot.slane %v455_v35, 4 }
 0x2eb   :  { %v448_v38 = vrot.slane %v447_v36, 2  ;;  %v457_v39 = vadd.f32 %v456_v37, %v455_v35 }
 0x2ed   :  { %v449_v40 = vadd.f32 %v448_v38, %v447_v36  ;;  %v458_v41 = vrot.slane %v457_v39, 2 }
 0x2ef   :  { %v450_v42 = vrot.slane %v449_v40, 1  ;;  %v459_v43 = vadd.f32 %v458_v41, %v457_v39 }
 0x2f1   :  { %v451_v44 = vadd.f32 %v450_v42, %v449_v40  ;;  %v460_v45 = vrot.slane %v459_v43, 1 }
 0x2f3   :  { %v452_v46 = vmul.f32 0.0625, %v451_v44  ;;  %v461_v47 = vadd.f32 %v460_v45, %v459_v43 }
 0x2f5   :  { %v462_v48 = vmul.f32 0.0625, %v461_v47  ;;  %v463_v49 = vmul.f32 %v452_v46, %v452_v46  ;;  %v909_v47 = vld [vmem:[%s1381_s3 + $0x3] sm:$0x1] }
 0x2f7   :  { %v464_v50 = vsub.f32 %v462_v48, %v463_v49 }
 0x2f9   :  { %v465_v51 = vmax.f32 %v464_v50, 0.0  ;;  %v910_v50 = vld [vmem:[%s1382_s4 + $0x3] sm:$0x1] }
 0x2fb   :  { %v468_v52 = vadd.f32 1e-05, %v465_v51 }
 0x2fd   :  { %1242 = vrsqrt.f32 %v468_v52 }
 0x30a   :  { %v1243_v54 = vpop.eup %1242 }
 0x30b   :  { %v470_v55 = vmul.f32 %v1243_v54, %v905_v53 }
 0x30d   :  { %v479_v57 = vrot.slane %v470_v55, %v1318_v2  ;;  %v473_v58 = vmul.f32 %v470_v55, %v452_v46 }
 0x30f   :  { %v474_v59 = vsub.f32 %v906_v56, %v473_v58  ;;  %v481_v60 = vmul.f32 %v479_v57, %v441_v30  ;;  %v482_v62 = vmul.f32 %v479_v57, %v442_v28 }
 0x311   :  { %v487_v61 = vrot.slane %v474_v59, %v1318_v2  ;;  %v807_v59 = vld [vmem:[#allocation2 + $0x2f8] sm:$0xff] }
 0x312   :  { %1200 = vmatprep.subr.mxu1 %v807_v59 }
 0x313   :  { %v489_v63 = vadd.f32 %v487_v61, %v481_v60  ;;  %v490_v0 = vadd.f32 %v487_v61, %v482_v62  ;;  %v806_v60 = vld [vmem:[#allocation2 + $0x2f0] sm:$0xff]  ;;  %v805_v61 = vld [vmem:[#allocation2 + $0x2e8] sm:$0xff]  ;;  %v804_v62 = vld [vmem:[#allocation2 + $0x2e0] sm:$0xff] }
 0x315   :  { %1162 = vmatprep.mubr.f32.mxu1 %v489_v63  ;;  %v803_v63 = vld [vmem:[#allocation2 + $0x2d8] sm:$0xff] }
 0x316   :  { %1163 = vmatmul.mubr.f32.vlgmr.msra.gmra.mxu1 %v490_v0  ;;  %v802_v0 = vld [vmem:[#allocation2 + $0x2d0] sm:$0xff] }
 0x317   :  { %1201 = vmatpush3.msra.mxu1 %v807_v59 }
 0x318   :  { %1202 = vmatprep.subr.mxu1 %v806_v60 }
 0x319   :  { %1203 = vmatpush3.msra.mxu1 %v806_v60 }
 0x31a   :  { %1204 = vmatprep.subr.mxu1 %v805_v61 }
 0x31b   :  { %1205 = vmatpush3.msra.mxu1 %v805_v61 }
 0x31c   :  { %1206 = vmatprep.subr.mxu1 %v804_v62 }
 0x31d   :  { %1207 = vmatpush3.msra.mxu1 %v804_v62 }
 0x31e   :  { %1208 = vmatprep.subr.mxu1 %v803_v63 }
 0x31f   :  { %1209 = vmatpush3.msra.mxu1 %v803_v63 }
 0x320   :  { %1210 = vmatprep.subr.mxu1 %v802_v0 }
 0x321   :  { %1211 = vmatpush3.msra.mxu1 %v802_v0 }
 0x322   :  { %1212 = vmatprep.subr.mxu1 %v801_v1 }
 0x323   :  { %1213 = vmatpush3.msra.mxu1 %v801_v1 }
 0x324   :  { %1214 = vmatprep.subr.mxu1 %v800_v3 }
 0x325   :  { %1215 = vmatpush3.msra.mxu1 %v800_v3 }
 0x326   :  { %1216 = vmatprep.subr.mxu1 %v799_v4 }
 0x327   :  { %1217 = vmatpush3.msra.mxu1 %v799_v4 }
 0x328   :  { %1218 = vmatprep.subr.mxu1 %v798_v5 }
 0x329   :  { %1219 = vmatpush3.msra.mxu1 %v798_v5 }
 0x32a   :  { %1220 = vmatprep.subr.mxu1 %v797_v6 }
 0x32b   :  { %1221 = vmatpush3.msra.mxu1 %v797_v6 }
 0x32c   :  { %1222 = vmatprep.subr.mxu1 %v796_v7 }
 0x32d   :  { %1223 = vmatpush3.msra.mxu1 %v796_v7 }
 0x32e   :  { %1224 = vmatprep.subr.mxu1 %v795_v8 }
 0x32f   :  { %1225 = vmatpush3.msra.mxu1 %v795_v8 }
 0x330   :  { %1226 = vmatprep.subr.mxu1 %v794_v9 }
 0x331   :  { %1227 = vmatpush3.msra.mxu1 %v794_v9 }
 0x332   :  { %1228 = vmatprep.subr.mxu1 %v793_v10 }
 0x333   :  { %1229 = vmatpush3.msra.mxu1 %v793_v10 }
 0x334   :  { %1230 = vmatprep.subr.mxu1 %v792_v11 }
 0x335   :  { %1231 = vmatpush3.msra.mxu1 %v792_v11 }
 0x3d6   :  { %v1164_v19 = vpop.f32.mrf.mxu1 }
 0x3d7   :  { %v588_v20 = vadd.f32 %v1164_v19, %v908_v18 }
 0x3d8   :  { %v582_v21 = vpop.f32.mrf.mxu1 }
 0x3d9   :  { %v592_v22 = vmax.f32 %v588_v20, 0.0  ;;  %v583_v23 = vadd.f32 %v908_v18, %v582_v21 }
 0x3db   :  { %v591_v24 = vmax.f32 %v583_v23, 0.0  ;;  %v604_v25 = vmul.f32 %v592_v22, %v592_v22 }
 0x3dd   :  { %v595_v26 = vadd.f32 %v592_v22, %v591_v24  ;;  %v603_v27 = vmul.f32 %v591_v24, %v591_v24 }
 0x3df   :  { %v596_v28 = vrot.slane %v595_v26, 4  ;;  %v605_v29 = vadd.f32 %v604_v25, %v603_v27 }
 0x3e1   :  { %v597_v30 = vadd.f32 %v596_v28, %v595_v26  ;;  %v606_v31 = vrot.slane %v605_v29, 4 }
 0x3e3   :  { %v598_v32 = vrot.slane %v597_v30, 2  ;;  %v607_v33 = vadd.f32 %v606_v31, %v605_v29 }
 0x3e5   :  { %v599_v34 = vadd.f32 %v598_v32, %v597_v30  ;;  %v608_v35 = vrot.slane %v607_v33, 2 }
 0x3e7   :  { %v600_v36 = vrot.slane %v599_v34, 1  ;;  %v609_v37 = vadd.f32 %v608_v35, %v607_v33 }
 0x3e9   :  { %v601_v38 = vadd.f32 %v600_v36, %v599_v34  ;;  %v610_v39 = vrot.slane %v609_v37, 1 }
 0x3eb   :  { %v602_v40 = vmul.f32 0.0625, %v601_v38  ;;  %v611_v41 = vadd.f32 %v610_v39, %v609_v37 }
 0x3ed   :  { %v612_v42 = vmul.f32 0.0625, %v611_v41  ;;  %v613_v43 = vmul.f32 %v602_v40, %v602_v40  ;;  %v913_v41 = vld [vmem:[%s1381_s3 + $0x4] sm:$0x1] }
 0x3ef   :  { %v614_v44 = vsub.f32 %v612_v42, %v613_v43 }
 0x3f1   :  { %v615_v45 = vmax.f32 %v614_v44, 0.0  ;;  %v914_v44 = vld [vmem:[%s1382_s4 + $0x4] sm:$0x1] }
 0x3f3   :  { %v618_v46 = vadd.f32 1e-05, %v615_v45 }
 0x3f5   :  { %1244 = vrsqrt.f32 %v618_v46 }
 0x402   :  { %v1245_v48 = vpop.eup %1244 }
 0x403   :  { %v620_v49 = vmul.f32 %v1245_v48, %v909_v47 }
 0x405   :  { %v629_v51 = vrot.slane %v620_v49, %v1318_v2  ;;  %v623_v52 = vmul.f32 %v620_v49, %v602_v40 }
 0x407   :  { %v624_v53 = vsub.f32 %v910_v50, %v623_v52  ;;  %v631_v54 = vmul.f32 %v629_v51, %v591_v24  ;;  %v632_v56 = vmul.f32 %v629_v51, %v592_v22 }
 0x409   :  { %v637_v55 = vrot.slane %v624_v53, %v1318_v2  ;;  %v916_v53 = vld [vmem:[%s1380_s2 + $0x5] ss:$0 sm:$0xff] }
 0x40b   :  { %v639_v57 = vadd.f32 %v637_v55, %v631_v54  ;;  %v640_v58 = vadd.f32 %v637_v55, %v632_v56 }
 0x40d   :  { %1197 = vmatprep.mubr.f32.mxu0 %v639_v57 }
 0x40e   :  { %1198 = vmatmul.mubr.f32.vlgmr.msra.gmra.mxu0 %v640_v58 }
 0x4ce   :  { %v1199_v13 = vpop.f32.mrf.mxu0 }
 0x4cf   :  { %v738_v14 = vadd.f32 %v1199_v13, %v912_v12 }
 0x4d0   :  { %v732_v15 = vpop.f32.mrf.mxu0 }
 0x4d1   :  { %v742_v16 = vmax.f32 %v738_v14, 0.0  ;;  %v733_v17 = vadd.f32 %v912_v12, %v732_v15 }
 0x4d3   :  { %v741_v18 = vmax.f32 %v733_v17, 0.0  ;;  %v754_v19 = vmul.f32 %v742_v16, %v742_v16 }
 0x4d5   :  { %v745_v20 = vadd.f32 %v742_v16, %v741_v18  ;;  %v753_v21 = vmul.f32 %v741_v18, %v741_v18 }
 0x4d7   :  { %v746_v22 = vrot.slane %v745_v20, 4  ;;  %v755_v23 = vadd.f32 %v754_v19, %v753_v21 }
 0x4d9   :  { %v747_v24 = vadd.f32 %v746_v22, %v745_v20  ;;  %v756_v25 = vrot.slane %v755_v23, 4 }
 0x4db   :  { %v748_v26 = vrot.slane %v747_v24, 2  ;;  %v757_v27 = vadd.f32 %v756_v25, %v755_v23 }
 0x4dd   :  { %v749_v28 = vadd.f32 %v748_v26, %v747_v24  ;;  %v758_v29 = vrot.slane %v757_v27, 2 }
 0x4df   :  { %v750_v30 = vrot.slane %v749_v28, 1  ;;  %v759_v31 = vadd.f32 %v758_v29, %v757_v27 }
 0x4e1   :  { %v751_v32 = vadd.f32 %v750_v30, %v749_v28  ;;  %v760_v33 = vrot.slane %v759_v31, 1 }
 0x4e3   :  { %v752_v34 = vmul.f32 0.0625, %v751_v32  ;;  %v761_v35 = vadd.f32 %v760_v33, %v759_v31 }
 0x4e5   :  { %v762_v36 = vmul.f32 0.0625, %v761_v35  ;;  %v763_v37 = vmul.f32 %v752_v34, %v752_v34 }
 0x4e7   :  { %v764_v38 = vsub.f32 %v762_v36, %v763_v37 }
 0x4e9   :  { %v765_v39 = vmax.f32 %v764_v38, 0.0 }
 0x4eb   :  { %v768_v40 = vadd.f32 1e-05, %v765_v39 }
 0x4ed   :  { %1246 = vrsqrt.f32 %v768_v40 }
 0x4fa   :  { %v1247_v42 = vpop.eup %1246 }
 0x4fb   :  { %v770_v43 = vmul.f32 %v1247_v42, %v913_v41 }
 0x4fd   :  { %v779_v45 = vrot.slane %v770_v43, %v1318_v2  ;;  %v773_v46 = vmul.f32 %v770_v43, %v752_v34 }
 0x4ff   :  { %v774_v47 = vsub.f32 %v914_v44, %v773_v46  ;;  %v781_v48 = vmul.f32 %v779_v45, %v741_v18  ;;  %v782_v50 = vmul.f32 %v779_v45, %v742_v16 }
 0x501   :  { %v787_v49 = vrot.slane %v774_v47, %v1318_v2 }
 0x503   :  { %v789_v51 = vadd.f32 %v787_v49, %v781_v48  ;;  %v790_v52 = vadd.f32 %v787_v49, %v782_v50 }
 0x505   :  { %1232 = vmatprep.mubr.f32.mxu1 %v789_v51 }
 0x506   :  { %1233 = vmatmul.mubr.f32.vlgmr.msra.gmra.mxu1 %v790_v52 }
 0x5c6   :  { %v1234_v54 = vpop.f32.mrf.mxu1 }
 0x5c7   :  { %v888_v55 = vadd.f32 %v1234_v54, %v916_v53 }
 0x5c8   :  { %v882_v56 = vpop.f32.mrf.mxu1 }
 0x5c9   :  { %892 = vst [vmem:[%s1383_s5 + $0x8] sm:$0xff] %v888_v55  ;;  %v883_v57 = vadd.f32 %v916_v53, %v882_v56 }
 0x5cb   :  { %891 = vst [vmem:[%s1383_s5] sm:$0xff] %v883_v57 }
 0x5cc   :  { %897 = vsyncpa [#allocation3], 1 }

</bundles_post_ra>
